<compile_context>
chip_gen: v7x
topology: tpu7x:2x2x1
jax: 0.10.0
libtpu: 0.0.40
codegen_flags: <defaults>
</compile_context>

<pallas_src>
import math

import jax
import jax.numpy as jnp
from jax.experimental import pallas as pl
from jax.experimental.pallas import tpu as pltpu

_LANE = 128


def _layer_scale_kernel(x_ref, gamma_ref, o_ref):
    # One VPU multiply per vreg; (tm, tn) * (1, tn) broadcasts over the sublane axis.
    o_ref[...] = x_ref[...] * gamma_ref[...]


def _sublane_multiple(dtype) -> int:
    # 8 for 4-byte dtypes, 16 for bf16/f16, 32 for 1-byte dtypes.
    return max(8, 32 // jnp.dtype(dtype).itemsize)


def _round_up(x: int, m: int) -> int:
    return ((x + m - 1) // m) * m


def layer_scale(
    x: jax.Array,
    gamma: jax.Array,
    *,
    target_block_bytes: int = 4 << 20,   # ~2-8 MiB per block saturates HBM on v5e/v6e/v7x
    inplace: bool = False,               # TODO(synk): mirrors torch mul_(); only a buffer alias, HBM traffic unchanged
) -> jax.Array:
    """x: (..., dim), gamma: (dim,). Returns x * gamma (broadcast over trailing dim)."""
    orig_shape = x.shape
    dim = orig_shape[-1]
    assert gamma.shape == (dim,)

    rows = math.prod(orig_shape[:-1]) if len(orig_shape) > 1 else 1
    itemsize = jnp.dtype(x.dtype).itemsize
    sub = _sublane_multiple(x.dtype)

    # ---- Lane-dense folding: if dim < 128 lanes, fold rows into the lane axis ----
    fold = 1
    if dim < _LANE and rows > 1:
        want = -(-_LANE // dim)  # ceil(128 / dim)
        for k in range(want, rows + 1):
            if rows % k == 0:
                fold = k
                break
        # If no divisor exists, fold stays 1 (correctness first; stores become masked).

    rows2 = rows // fold
    D = dim * fold
    x2d = x.reshape(rows2, D)
    # Note: gamma is cast to x.dtype (bf16 x => bf16 gamma product), fine for LayerScale.
    gamma_row = jnp.tile(gamma.astype(x.dtype), fold).reshape(1, D)

    # ---- Dim tiling: only split D when it is 128-aligned and very wide ----
    MAX_TN = 8192
    if D % _LANE == 0 and D > MAX_TN:
        tn = MAX_TN
    else:
        tn = D  # full-extent last dim is always layout-legal

    # ---- Row tiling: size the block from the byte target ----
    tm = max(sub, target_block_bytes // max(1, tn * itemsize))
    tm = _round_up(tm, sub)
    # Keep one tile <= ~12 MiB so 2x(in)+2x(out) double buffers stay v7x-safe (<~56 MiB).
    max_tile_bytes = 12 << 20
    while tm > sub and tm * tn * itemsize > max_tile_bytes:
        tm = _round_up(max(sub, tm // 2), sub)
    if rows2 <= tm:
        tm = rows2  # full extent: always layout-legal, single row-tile

    grid = (pl.cdiv(rows2, tm), pl.cdiv(D, tn))

    # Explicit VMEM budget: 2 double-buffered tiles each for input and output,
    # plus the gamma block and headroom; capped at a v7x-safe limit.
    tile_bytes = tm * tn * itemsize
    vmem_limit = 4 * tile_bytes + 2 * tn * itemsize + (8 << 20)
    vmem_limit = int(min(max(vmem_limit, 16 << 20), 56 << 20))

    extra = {}
    if inplace:
        extra["input_output_aliases"] = {0: 0}

    out = pl.pallas_call(
        _layer_scale_kernel,
        out_shape=jax.ShapeDtypeStruct((rows2, D), x.dtype),
        grid_spec=pltpu.PrefetchScalarGridSpec(
            num_scalar_prefetch=0,
            grid=grid,
            in_specs=[
                pl.BlockSpec((tm, tn), lambda i, j: (i, j)),
                pl.BlockSpec((1, tn), lambda i, j: (0, j)),
            ],
            out_specs=pl.BlockSpec((tm, tn), lambda i, j: (i, j)),
        ),
        compiler_params=pltpu.CompilerParams(
            dimension_semantics=("parallel", "parallel"),
            vmem_limit_bytes=vmem_limit,
        ),
        **extra,
    )(x2d, gamma_row)

    return out.reshape(orig_shape)


if __name__ == "__main__":
    key = jax.random.PRNGKey(0)
    init_values = 1e-5

    # Case 1: module-spec shapes (batch=2, seq=8, dim=32) -> exercises the lane-folding path.
    batch, seq, dim = 2, 8, 32
    x = jax.random.normal(key, (batch, seq, dim), dtype=jnp.float32)
    gamma = init_values * jnp.ones((dim,), dtype=jnp.float32)  # nn.Parameter(init_values * ones(dim))
    out = jax.block_until_ready(layer_scale(x, gamma))
    ref = x * gamma
    assert out.shape == x.shape
    assert jnp.allclose(out, ref, atol=1e-6, rtol=1e-6)

    # Case 2: small shape with a non-divisible row count and dim >= 128
    # -> exercises the cdiv grid / masked last block path (tiny block target to force >1 tile).
    key2 = jax.random.PRNGKey(0)
    x2 = jax.random.normal(key2, (4, 52, 160), dtype=jnp.float32)
    gamma2 = init_values * jnp.ones((160,), dtype=jnp.float32)
    out2 = jax.block_until_ready(layer_scale(x2, gamma2, target_block_bytes=64 << 10))
    ref2 = x2 * gamma2
    assert out2.shape == x2.shape
    assert jnp.allclose(out2, ref2, atol=1e-6, rtol=1e-6)

    print("KERNEL_OK")
</pallas_src>

<mosaic_0001>
module attributes {stable_mosaic.version = 11 : i64} {
  func.func @_layer_scale_kernel(%arg0: i32, %arg1: i32, %arg2: memref<4x128xf32, #tpu.memory_space<vmem>>, %arg3: memref<1x128xf32, #tpu.memory_space<vmem>>, %arg4: memref<4x128xf32, #tpu.memory_space<vmem>>) attributes {dimension_semantics = [#tpu.dimension_semantics<parallel>, #tpu.dimension_semantics<parallel>], iteration_bounds = array<i64: 1, 1>, scalar_prefetch = 0 : i64, scratch_operands = 0 : i64, tpu.core_type = #tpu.core_type<tc>, window_params = [{transform_indices = @transform_0, window_bounds = array<i64: 4, 128>}, {transform_indices = @transform_1, window_bounds = array<i64: 1, 128>}, {transform_indices = @transform_2, window_bounds = array<i64: 4, 128>}]} {
    %c0 = arith.constant 0 : index
    %c0_0 = arith.constant 0 : index
    %0 = vector.load %arg2[%c0, %c0_0] : memref<4x128xf32, #tpu.memory_space<vmem>>, vector<4x128xf32>
    %c0_1 = arith.constant 0 : index
    %c0_2 = arith.constant 0 : index
    %1 = vector.load %arg3[%c0_1, %c0_2] : memref<1x128xf32, #tpu.memory_space<vmem>>, vector<1x128xf32>
    %2 = vector.broadcast %1 : vector<1x128xf32> to vector<4x128xf32>
    %3 = arith.mulf %0, %2 : vector<4x128xf32>
    %c0_3 = arith.constant 0 : index
    %c0_4 = arith.constant 0 : index
    %4 = vector.load %arg4[%c0_3, %c0_4] : memref<4x128xf32, #tpu.memory_space<vmem>>, vector<4x128xf32>
    tpu.vector_store %arg4[%c0_3, %c0_4], %3 {strides = array<i32>} : memref<4x128xf32, #tpu.memory_space<vmem>>, vector<4x128xf32>,
    return
  }
  func.func @transform_0(%arg0: i32, %arg1: i32) -> (i32, i32) {
    %c0_i32 = arith.constant 0 : i32
    return %arg0, %arg1 : i32, i32
  }
  func.func @transform_1(%arg0: i32, %arg1: i32) -> (i32, i32) {
    %c0_i32 = arith.constant 0 : i32
    %c0_i32_0 = arith.constant 0 : i32
    return %c0_i32, %arg1 : i32, i32
  }
  func.func @transform_2(%arg0: i32, %arg1: i32) -> (i32, i32) {
    %c0_i32 = arith.constant 0 : i32
    return %arg0, %arg1 : i32, i32
  }
}

</mosaic_0001>

<bundles_post_ra>
// kernel: tpu_custom_call.1
= control target key start
LH: loop header
LB: loop body
LE: loop exit
PB: predicated region body
PF: predicated region fallthrough
CT: control target
= control target key end

     0   :  { %7 = vsyncpa [#allocation3], 0  ;;  %s144_s0 = inlined_call_operand.hbm [shape: f32[4,128], index: 0, kind: input, shape index: {}]   ;;  %s145_s1 = inlined_call_operand.vmem [shape: f32[1,128], index: 1, kind: input, shape index: {}]   ;;  %s146_s2 = inlined_call_operand.hbm [shape: f32[4,128], index: 2, kind: output, shape index: {}]  }
   0x1   :  { %8 = vsyncpa [#allocation4], 0  ;;  %s100_s9 = smov [#allocation2]   ;;  %s52_s13 = scalar_lea.hbm %s144_s0, 64 }
   0x2   :  { %s15_s10 = sshll.u32 %s100_s9, 4  ;;  %p53_p0 = scmp.ne.s32.totalorder %s144_s0, %s52_s13  ;;  %s16_s10 = int_to_ptr.vmem [resolvable:$true] %s15_s10 }
   0x3   :  { %p56_p1 = scmp.lt.u32.totalorder %s52_s13, %s144_s0 }
   0x5   :  { %p58_p2 = pnand %p56_p1, %p53_p0 }
   0x7   :  { %61 = shalt.err (!%p58_p2)
}
   0x8   :  { %s62_s18 = scalar_lea.vmem %s16_s10, 64  ;;  %p67_p4 = scmp.lt.s32.totalorder %s16_s10, %s16_s10 }
   0x9   :  { %p63_p3 = scmp.ne.s32.totalorder %s16_s10, %s62_s18  ;;  %p68_p5 = scmp.lt.s32.totalorder %s62_s18, %s62_s18 }
   0xb   :  { %p69_p6 = por %p68_p5, %p67_p4 }
   0xd   :  { %p70_p7 = pnand %p69_p6, %p63_p3 }
   0xf   :  { %73 = shalt.err (!%p70_p7)
}
  0x10   :  { %18 = dma.hbm_to_vmem [thread:$0]  %s144_s0, 64, %s16_s10, [#allocation3]  }
  0x11   :  { %96 = dma.done.wait [#allocation3], 64  }
  0x12   :  { %97 = vsyncadd [#allocation3], 4294967232  ;;  %s101_s21 = smov [#allocation5]   ;;  %v24_v0 = vld [vmem:[#allocation2] sm:$0xf] }
  0x13   :  { %s40_s22 = sshll.u32 %s101_s21, 4  ;;  %v49_v1 = vld [vmem:[%s145_s1] ss:$0 sm:$0xff]  ;;  %s41_s22 = int_to_ptr.vmem [resolvable:$true] %s40_s22 }
  0x14   :  { %v32_v2 = vmul.f32 %v49_v1, %v24_v0  ;;  %s74_s25 = scalar_lea.vmem %s41_s22, 64  ;;  %p79_p9 = scmp.lt.s32.totalorder %s41_s22, %s41_s22 }
  0x15   :  { %p75_p8 = scmp.ne.s32.totalorder %s41_s22, %s74_s25  ;;  %p80_p10 = scmp.lt.s32.totalorder %s74_s25, %s74_s25 }
  0x16   :  { %33 = vst [vmem:[#allocation5] sm:$0xf] %v32_v2 }
  0x17   :  { %p81_p11 = por %p80_p10, %p79_p9 }
  0x19   :  { %p82_p12 = pnand %p81_p11, %p75_p8 }
  0x1b   :  { %85 = shalt.err (!%p82_p12)
}
  0x1c   :  { %s86_s27 = scalar_lea.hbm %s146_s2, 64 }
  0x1d   :  { %p87_p13 = scmp.ne.s32.totalorder %s146_s2, %s86_s27  ;;  %p90_p0 = scmp.lt.u32.totalorder %s86_s27, %s146_s2 }
  0x1f   :  { %p92_p1 = pnand %p90_p0, %p87_p13 }
  0x21   :  { %95 = shalt.err (!%p92_p1)
}
  0x22   :  { %43 = dma.vmem_to_hbm [thread:$0]  %s41_s22, 64, %s146_s2, [#allocation4]  }
  0x23   :  { %98 = dma.done.wait [#allocation4], 64  }
  0x24   :  { %99 = vsyncadd [#allocation4], 4294967232 }
  0x25   :  { %47 = vsyncpa [#allocation3], 1 }
  0x26   :  { %48 = vsyncpa [#allocation4], 1 }

</bundles_post_ra>
